<compile_context>
chip_gen: v7x
topology: tpu7x:2x2x1
jax: 0.10.0
libtpu: 0.0.40
codegen_flags: <defaults>
</compile_context>

<pallas_src>
from functools import partial

import jax
import jax.numpy as jnp
from jax.experimental import pallas as pl
from jax.experimental.pallas import tpu as pltpu


def bfnn_kernel(x_ref, w1_ref, b1_ref, w2_ref, b2_ref, w3_ref, b3_ref, o_ref):
    x = x_ref[...]                                                    # (6, TB)
    h1 = jnp.dot(w1_ref[...], x, preferred_element_type=jnp.float32) + b1_ref[...]
    h1 = jnp.maximum(h1, 0.0)                                         # (12, TB)
    h2 = jnp.dot(w2_ref[...], h1, preferred_element_type=jnp.float32) + b2_ref[...]
    h2 = jnp.maximum(h2, 0.0)                                         # (12, TB)
    h3 = jnp.dot(w3_ref[...], h2, preferred_element_type=jnp.float32) + b3_ref[...]
    o_ref[...] = jnp.maximum(h3, 0.0)                                 # (1, TB)


def _round_up(n, m):
    return ((n + m - 1) // m) * m


def _default_tb_cap():
    """Per-generation batch-tile cap.

    VMEM per step (double-buffered x block, 8-sublane-padded in VMEM, plus the
    (1, TB) out block which also pads 8x in sublanes):
      TB = 64K  -> ~8 MiB   (fits v5e's 16 MiB default scoped VMEM)
      TB = 128K -> ~16 MiB  (fits v6e / v7x 32 MiB default scoped VMEM)
    Larger tiles amortize the ~0.35 us per-grid-step pipeline overhead against
    per-step DMA (24 B per batch element).
    """
    try:
        kind = jax.devices()[0].device_kind.lower()
    except Exception:
        return 65536
    if "v6" in kind or "v7" in kind or "7x" in kind:
        return 131072
    return 65536


def _pick_tb(batch, tb):
    cap = tb if tb is not None else _default_tb_cap()
    cap = max(128, _round_up(cap, 128))           # lane-dense tiles only
    return min(cap, _round_up(batch, 128))


def _bfnn_pallas(x_fm, params, tb):
    """Core pallas_call. x_fm: (6, Bk) f32 feature-major. Returns (1, Bk) f32."""
    w1, b1, w2, b2, w3, b3 = params               # w: (out, in), b: (out, 1)
    F, Bk = x_fm.shape
    grid = (pl.cdiv(Bk, tb),)                     # many steps at large B ->
                                                  # v7x megacore shards them
    resident = lambda a: pl.BlockSpec(a.shape, lambda i: (0, 0))   # stays in VMEM

    return pl.pallas_call(
        bfnn_kernel,
        out_shape=jax.ShapeDtypeStruct((1, Bk), jnp.float32),
        grid=grid,
        in_specs=[
            pl.BlockSpec((F, tb), lambda i: (0, i)),   # stream batch, 6 rows (no pad)
            resident(w1), resident(b1),
            resident(w2), resident(b2),
            resident(w3), resident(b3),
        ],
        out_specs=pl.BlockSpec((1, tb), lambda i: (0, i)),          # lane-dense out
        compiler_params=pltpu.CompilerParams(
            dimension_semantics=("parallel",)),
        cost_estimate=pl.CostEstimate(
            flops=456 * Bk, transcendentals=0, bytes_accessed=28 * Bk + 1024),
    )(x_fm, w1, b1, w2, b2, w3, b3)


@partial(jax.jit, static_argnames=("tb",))
def bfnn_forward_fm(x_fm, params, tb=None):
    """Fast path: feature-major input x_fm of shape (6, B), batch on lanes.

    No wrapper-side relayout / extra HBM pass — the kernel streams x_fm
    directly (~24 B/elem read + 4 B/elem write).  Returns (1, B) f32.
    B is ideally a multiple of 128 (HBM lane tiling); non-multiples fall back
    to a ragged final block.
    """
    assert x_fm.ndim == 2 and x_fm.shape[0] == 6, x_fm.shape
    TB = _pick_tb(x_fm.shape[1], tb)
    return _bfnn_pallas(x_fm.astype(jnp.float32), params, TB)


@partial(jax.jit, static_argnames=("tb",))
def bfnn_forward(x, params, tb=None):
    """PyTorch-layout path: x of shape (B, ...) flattening to 6 features.

    Performs exactly ONE relayout pass (natural (B,6) -> feature-major (6,Bp),
    no 8-row pad) before the kernel; prefer `bfnn_forward_fm` at scale to
    avoid even that pass.  Returns (B, 1) f32, matching the PyTorch module.
    """
    B = x.shape[0]
    x2d = x.reshape(B, -1).astype(jnp.float32)    # nn.Flatten + .float()
    F = x2d.shape[1]
    assert F == 6, f"expected 6 flattened features, got {F}"

    TB = _pick_tb(B, tb)
    Bp = _round_up(B, TB)                         # grid divides exactly
    # Single fused XLA op: transpose + lane pad into the (6, Bp) kernel operand.
    x_fm = jnp.zeros((F, Bp), jnp.float32).at[:, :B].set(x2d.T)

    out = _bfnn_pallas(x_fm, params, TB)          # (1, Bp)
    return out[:, :B].T                           # (B, 1)


def init_params(key):
    """torch.nn.Linear-style init: U[-1/sqrt(fan_in), 1/sqrt(fan_in)].
    Weights stored (out, in), biases (out, 1) — the layout the kernel consumes."""
    def linear(key, fan_in, fan_out):
        kw, kb = jax.random.split(key)
        bound = 1.0 / jnp.sqrt(jnp.float32(fan_in))
        w = jax.random.uniform(kw, (fan_out, fan_in), jnp.float32, -bound, bound)
        b = jax.random.uniform(kb, (fan_out, 1), jnp.float32, -bound, bound)
        return w, b

    k1, k2, k3 = jax.random.split(key, 3)
    w1, b1 = linear(k1, 6, 12)
    w2, b2 = linear(k2, 12, 12)
    w3, b3 = linear(k3, 12, 1)
    return (w1, b1, w2, b2, w3, b3)


def reference_forward(x, params):
    """Pure-JAX reference (and the recommended path for tiny batches)."""
    w1, b1, w2, b2, w3, b3 = params
    h = x.reshape(x.shape[0], -1).astype(jnp.float32)
    h = jnp.maximum(h @ w1.T + b1.T, 0.0)
    h = jnp.maximum(h @ w2.T + b2.T, 0.0)
    h = jnp.maximum(h @ w3.T + b3.T, 0.0)
    return h


if __name__ == "__main__":
    key = jax.random.PRNGKey(0)
    kx1, kx2, kx3, kx4, kp = jax.random.split(key, 5)
    params = init_params(kp)

    # 1) PyTorch-layout input whose trailing dims flatten to 6 features (B=8).
    x_small = jax.random.normal(kx1, (8, 2, 3), dtype=jnp.float32)
    out_small = jax.block_until_ready(bfnn_forward(x_small, params))
    ref_small = reference_forward(x_small, params)
    assert out_small.shape == (8, 1), out_small.shape
    assert jnp.allclose(out_small, ref_small, atol=1e-5, rtol=1e-5), \
        "mismatch vs JAX reference (B=8)"

    # 2) Lane padding inside a single tile (B=300 -> Bp=384, grid=1).
    x_mid = jax.random.normal(kx2, (300, 6), dtype=jnp.float32)
    out_mid = jax.block_until_ready(bfnn_forward(x_mid, params))
    ref_mid = reference_forward(x_mid, params)
    assert out_mid.shape == (300, 1), out_mid.shape
    assert jnp.allclose(out_mid, ref_mid, atol=1e-5, rtol=1e-5), \
        "mismatch vs JAX reference (B=300)"

    # 3) Multi-step pipelined grid (B=1000, tb=256 -> Bp=1024, 4 grid steps).
    x_big = jax.random.normal(kx3, (1000, 6), dtype=jnp.float32)
    out_big = jax.block_until_ready(bfnn_forward(x_big, params, tb=256))
    ref_big = reference_forward(x_big, params)
    assert out_big.shape == (1000, 1), out_big.shape
    assert jnp.allclose(out_big, ref_big, atol=1e-5, rtol=1e-5), \
        "mismatch vs JAX reference (B=1000, 4 grid steps)"

    # 4) Zero-relayout feature-major fast path (B=1024, tb=256 -> 4 grid steps).
    x_fm = jax.random.normal(kx4, (6, 1024), dtype=jnp.float32)
    out_fm = jax.block_until_ready(bfnn_forward_fm(x_fm, params, tb=256))
    ref_fm = reference_forward(x_fm.T, params)
    assert out_fm.shape == (1, 1024), out_fm.shape
    assert jnp.allclose(out_fm.T, ref_fm, atol=1e-5, rtol=1e-5), \
        "mismatch vs JAX reference (feature-major fast path)"

    print("KERNEL_OK")
</pallas_src>

<mosaic_0001>
module attributes {stable_mosaic.version = 11 : i64} {
  func.func @bfnn_kernel(%arg0: i32, %arg1: memref<6x128xf32, #tpu.memory_space<vmem>>, %arg2: memref<12x6xf32, #tpu.memory_space<vmem>>, %arg3: memref<12x1xf32, #tpu.memory_space<vmem>>, %arg4: memref<12x12xf32, #tpu.memory_space<vmem>>, %arg5: memref<12x1xf32, #tpu.memory_space<vmem>>, %arg6: memref<1x12xf32, #tpu.memory_space<vmem>>, %arg7: memref<1x1xf32, #tpu.memory_space<vmem>>, %arg8: memref<1x128xf32, #tpu.memory_space<vmem>>) attributes {dimension_semantics = [#tpu.dimension_semantics<parallel>], iteration_bounds = array<i64: 1>, scalar_prefetch = 0 : i64, scratch_operands = 0 : i64, tpu.core_type = #tpu.core_type<tc>, window_params = [{transform_indices = @transform_0, window_bounds = array<i64: 6, 128>}, {pipeline_mode = #tpu.pipeline_mode<synchronous>, transform_indices = @transform_1, window_bounds = array<i64: 12, 6>}, {pipeline_mode = #tpu.pipeline_mode<synchronous>, transform_indices = @transform_2, window_bounds = array<i64: 12, 1>}, {pipeline_mode = #tpu.pipeline_mode<synchronous>, transform_indices = @transform_3, window_bounds = array<i64: 12, 12>}, {pipeline_mode = #tpu.pipeline_mode<synchronous>, transform_indices = @transform_4, window_bounds = array<i64: 12, 1>}, {pipeline_mode = #tpu.pipeline_mode<synchronous>, transform_indices = @transform_5, window_bounds = array<i64: 1, 12>}, {pipeline_mode = #tpu.pipeline_mode<synchronous>, transform_indices = @transform_6, window_bounds = array<i64: 1, 1>}, {transform_indices = @transform_7, window_bounds = array<i64: 1, 128>}]} {
    %c0 = arith.constant 0 : index
    %c0_0 = arith.constant 0 : index
    %0 = vector.load %arg1[%c0, %c0_0] : memref<6x128xf32, #tpu.memory_space<vmem>>, vector<6x128xf32>
    %c0_1 = arith.constant 0 : index
    %c0_2 = arith.constant 0 : index
    %1 = vector.load %arg2[%c0_1, %c0_2] : memref<12x6xf32, #tpu.memory_space<vmem>>, vector<12x6xf32>
    %cst = arith.constant dense<0.000000e+00> : vector<12x128xf32>
    %2 = tpu.matmul %1, %0, %cst {dimension_numbers = #tpu.dot_dimension_numbers<[1], [0], [0], [1], [0, 0, 1, 1], [], []>} : vector<12x6xf32>, vector<6x128xf32>, vector<12x128xf32> -> vector<12x128xf32>
    %c0_3 = arith.constant 0 : index
    %c0_4 = arith.constant 0 : index
    %3 = vector.load %arg3[%c0_3, %c0_4] : memref<12x1xf32, #tpu.memory_space<vmem>>, vector<12x1xf32>
    %4 = vector.broadcast %3 : vector<12x1xf32> to vector<12x128xf32>
    %5 = arith.addf %2, %4 : vector<12x128xf32>
    %cst_5 = arith.constant 0.000000e+00 : f32
    %6 = vector.broadcast %cst_5 : f32 to vector<12x128xf32>
    %7 = arith.maximumf %5, %6 : vector<12x128xf32>
    %c0_6 = arith.constant 0 : index
    %c0_7 = arith.constant 0 : index
    %8 = vector.load %arg4[%c0_6, %c0_7] : memref<12x12xf32, #tpu.memory_space<vmem>>, vector<12x12xf32>
    %cst_8 = arith.constant dense<0.000000e+00> : vector<12x128xf32>
    %9 = tpu.matmul %8, %7, %cst_8 {dimension_numbers = #tpu.dot_dimension_numbers<[1], [0], [0], [1], [0, 0, 1, 1], [], []>} : vector<12x12xf32>, vector<12x128xf32>, vector<12x128xf32> -> vector<12x128xf32>
    %c0_9 = arith.constant 0 : index
    %c0_10 = arith.constant 0 : index
    %10 = vector.load %arg5[%c0_9, %c0_10] : memref<12x1xf32, #tpu.memory_space<vmem>>, vector<12x1xf32>
    %11 = vector.broadcast %10 : vector<12x1xf32> to vector<12x128xf32>
    %12 = arith.addf %9, %11 : vector<12x128xf32>
    %cst_11 = arith.constant 0.000000e+00 : f32
    %13 = vector.broadcast %cst_11 : f32 to vector<12x128xf32>
    %14 = arith.maximumf %12, %13 : vector<12x128xf32>
    %c0_12 = arith.constant 0 : index
    %c0_13 = arith.constant 0 : index
    %15 = vector.load %arg6[%c0_12, %c0_13] : memref<1x12xf32, #tpu.memory_space<vmem>>, vector<1x12xf32>
    %cst_14 = arith.constant dense<0.000000e+00> : vector<1x128xf32>
    %16 = tpu.matmul %15, %14, %cst_14 {dimension_numbers = #tpu.dot_dimension_numbers<[1], [0], [0], [1], [0, 0, 1, 1], [], []>} : vector<1x12xf32>, vector<12x128xf32>, vector<1x128xf32> -> vector<1x128xf32>
    %c0_15 = arith.constant 0 : index
    %c0_16 = arith.constant 0 : index
    %17 = vector.load %arg7[%c0_15, %c0_16] : memref<1x1xf32, #tpu.memory_space<vmem>>, vector<1x1xf32>
    %18 = vector.broadcast %17 : vector<1x1xf32> to vector<1x128xf32>
    %19 = arith.addf %16, %18 : vector<1x128xf32>
    %cst_17 = arith.constant 0.000000e+00 : f32
    %20 = vector.broadcast %cst_17 : f32 to vector<1x128xf32>
    %21 = arith.maximumf %19, %20 : vector<1x128xf32>
    %c0_18 = arith.constant 0 : index
    %c0_19 = arith.constant 0 : index
    %22 = vector.load %arg8[%c0_18, %c0_19] : memref<1x128xf32, #tpu.memory_space<vmem>>, vector<1x128xf32>
    tpu.vector_store %arg8[%c0_18, %c0_19], %21 {strides = array<i32>} : memref<1x128xf32, #tpu.memory_space<vmem>>, vector<1x128xf32>,
    return
  }
  func.func @transform_0(%arg0: i32) -> (i32, i32) {
    %c0_i32 = arith.constant 0 : i32
    %c0_i32_0 = arith.constant 0 : i32
    return %c0_i32, %arg0 : i32, i32
  }
  func.func @transform_1(%arg0: i32) -> (i32, i32) {
    %c0_i32 = arith.constant 0 : i32
    %c0_i32_0 = arith.constant 0 : i32
    %c0_i32_1 = arith.constant 0 : i32
    return %c0_i32, %c0_i32_0 : i32, i32
  }
  func.func @transform_2(%arg0: i32) -> (i32, i32) {
    %c0_i32 = arith.constant 0 : i32
    %c0_i32_0 = arith.constant 0 : i32
    %c0_i32_1 = arith.constant 0 : i32
    return %c0_i32, %c0_i32_0 : i32, i32
  }
  func.func @transform_3(%arg0: i32) -> (i32, i32) {
    %c0_i32 = arith.constant 0 : i32
    %c0_i32_0 = arith.constant 0 : i32
    %c0_i32_1 = arith.constant 0 : i32
    return %c0_i32, %c0_i32_0 : i32, i32
  }
  func.func @transform_4(%arg0: i32) -> (i32, i32) {
    %c0_i32 = arith.constant 0 : i32
    %c0_i32_0 = arith.constant 0 : i32
    %c0_i32_1 = arith.constant 0 : i32
    return %c0_i32, %c0_i32_0 : i32, i32
  }
  func.func @transform_5(%arg0: i32) -> (i32, i32) {
    %c0_i32 = arith.constant 0 : i32
    %c0_i32_0 = arith.constant 0 : i32
    %c0_i32_1 = arith.constant 0 : i32
    return %c0_i32, %c0_i32_0 : i32, i32
  }
  func.func @transform_6(%arg0: i32) -> (i32, i32) {
    %c0_i32 = arith.constant 0 : i32
    %c0_i32_0 = arith.constant 0 : i32
    %c0_i32_1 = arith.constant 0 : i32
    return %c0_i32, %c0_i32_0 : i32, i32
  }
  func.func @transform_7(%arg0: i32) -> (i32, i32) {
    %c0_i32 = arith.constant 0 : i32
    %c0_i32_0 = arith.constant 0 : i32
    return %c0_i32, %arg0 : i32, i32
  }
}

</mosaic_0001>

<bundles_post_ra>
// kernel: bfnn_forward.1
= control target key start
LH: loop header
LB: loop body
LE: loop exit
PB: predicated region body
PF: predicated region fallthrough
CT: control target
= control target key end

     0   :  { %vm50_vm0 = vcmask 1045504   ;;  %vm43_vm1 = vcmask 48128   ;;  %v380_v3 = vmov 0   ;;  %vm145_vm2 = vcmask 97280   ;;  %s478_s0 = inlined_call_operand.vmem [shape: f32[6,128], index: 0, kind: input, shape index: {}]   ;;  %s479_s1 = inlined_call_operand.vmem [shape: f32[12,6], index: 1, kind: input, shape index: {}]   ;;  %s480_s2 = inlined_call_operand.vmem [shape: f32[12,1], index: 2, kind: input, shape index: {}]   ;;  %s481_s6 = inlined_call_operand.<no memory space> [shape: f32[1,1], index: 6, kind: input, shape index: {}]   ;;  %s482_s3 = inlined_call_operand.vmem [shape: f32[12,12], index: 3, kind: input, shape index: {}]   ;;  %s483_s4 = inlined_call_operand.vmem [shape: f32[12,1], index: 4, kind: input, shape index: {}]   ;;  %s484_s5 = inlined_call_operand.vmem [shape: f32[1,12], index: 5, kind: input, shape index: {}]   ;;  %s485_s7 = inlined_call_operand.vmem [shape: f32[1,128], index: 7, kind: output, shape index: {}]  }
   0x1   :  { %v28_v0 = vld [vmem:[%s478_s0] sm:$0x3f]  ;;  %v30_v2 = vld [vmem:[%s479_s1 + $0x8] sm:$0xf]  ;;  %378 = vset.pattern.permute.xlu0 %v380_v3  ;;  %v12_v4 = vstv %s481_s6  ;;  %379 = vset.pattern.permute.xlu1 %v380_v3  ;;  %vm152_vm3 = vcmask 1043456   ;;  %vm381_vm4 = vmmov 1   ;;  %v240_v34 = vlaneseq }
   0x2   :  { %v29_v1 = vld [vmem:[%s479_s1] sm:$0xff]  ;;  %344 = vmatprep.subr.msk.mxu0 %vm50_vm0, %v28_v0  ;;  %13 = vst [vmem:[#allocation2] sm:$0x1] %v12_v4  ;;  %v32_v6 = vld [vmem:[%s480_s2 + $0x8] sm:$0xf]  ;;  %vm457_vm5 = vmpackc.low %vm152_vm3, %vm381_vm4  ;;  %v382_v22 = vmov 0.0|0.0  }
   0x3   :  { %346 = vmatprep.mubr.msk.f32.mxu0 %vm43_vm1, %v29_v1  ;;  %v31_v5 = vld [vmem:[%s480_s2] sm:$0xff]  ;;  %345 = vmatpush3.msk.msra.mxu0 %vm50_vm0, %v28_v0  ;;  %v134_v10 = vld [vmem:[%s483_s4 + $0x8] sm:$0xf]  ;;  %vm383_vm6 = vmmov 0   ;;  %v384_v23 = vmov 0.0   ;;  %v241_v35 = vshrl.u32 %v240_v34, 7 }
   0x4   :  { %35 = vperm.xlu0 %378, %v31_v5   ;;  %347 = vmatmul.mubr.msk.f32.vlgmr.msra.gmra.mrb[0].mxu0 %vm43_vm1, %v30_v2  ;;  %v131_v8 = vld [vmem:[%s482_s3] sm:$0xff]  ;;  %v132_v21 = vld [vmem:[%s482_s3 + $0x8] sm:$0xf] }
   0x5   :  { %353 = vmatprep.mubr.msk.f32.mxu1 %vm145_vm2, %v131_v8  ;;  %v133_v9 = vld [vmem:[%s483_s4] sm:$0xff]  ;;  %369 = vmatprep.subr.bf16.mxu0 %v382_v22  ;;  %v242_v36 = vsub.s32 0, %v241_v35 }
   0x6   :  { %137 = vperm.xlu1 %379, %v133_v9   ;;  %360 = vmatprep.mubr.msk.f32.mxu0 %vm383_vm6, %v384_v23  ;;  %v233_v33 = vld [vmem:[%s484_s5] sm:$0x1] }
   0x8   :  { %40 = vperm.xlu0 %378, %v32_v6  }
   0x9   :  { %v234_v7 = vld [vmem:[#allocation2] sm:$0x1] }
   0xa   :  { %142 = vperm.xlu1 %379, %v134_v10  }
   0xc   :  { %237 = vperm.xlu0 %378, %v234_v7  }
  0x83   :  { %v36_v11 = vpop.permute.xlu0 %35 }
  0x85   :  { %v138_v24 = vpop.permute.xlu1 %137 }
  0x87   :  { %v41_v12 = vpop.permute.xlu0 %40 }
  0x89   :  { %v143_v25 = vpop.permute.xlu1 %142 }
  0x8b   :  { %v238_v37 = vpop.permute.xlu0 %237 }
  0x8c   :  { %v243_v38 = vrot.slane %v238_v37, %v242_v36 }
  0xd7   :  { %v348_v13 = vpop.f32.mrb[0].mxu0 }
  0xd8   :  { %v126_v14 = vadd.f32 %v348_v13, %v41_v12  ;;  %v120_v15 = vpop.f32.mrb[1].mxu0 }
  0xd9   :  { %v121_v16 = vadd.f32 %v120_v15, %v36_v11 }
  0xda   :  { %v130_v17 = vmax.f32 %v126_v14, 0.0 }
  0xdb   :  { %v129_v18 = vmax.f32 %v121_v16, 0.0 }
  0xdd   :  { %v363_v20 = vpack.c.bf16 %v130_v17, %v129_v18 }
  0xdf   :  { %365 = vmatprep.subr.msk.bf16.mxu1 %vm457_vm5, %v363_v20 }
  0xe0   :  { %368 = vmatpush3.bf16.msk.msra.mxu1 %vm457_vm5, %v363_v20 }
  0xe3   :  { %354 = vmatmul.mubr.msk.f32.vlgmr.msra.gmra.mrb[0].mxu1 %vm145_vm2, %v132_v21 }
 0x1b6   :  { %v355_v26 = vpop.f32.mrb[0].mxu1 }
 0x1b7   :  { %v228_v27 = vadd.f32 %v355_v26, %v143_v25  ;;  %v222_v28 = vpop.f32.mrb[1].mxu1 }
 0x1b8   :  { %v223_v29 = vadd.f32 %v222_v28, %v138_v24 }
 0x1b9   :  { %v232_v30 = vmax.f32 %v228_v27, 0.0 }
 0x1ba   :  { %v231_v31 = vmax.f32 %v223_v29, 0.0 }
 0x1bc   :  { %v370_v32 = vpack.c.bf16 %v232_v30, %v231_v31 }
 0x1be   :  { %372 = vmatpush3.bf16.msk.msra.mxu0 %vm457_vm5, %v370_v32 }
 0x1c1   :  { %361 = vmatmul.mubr.msk.f32.vlgmr.msra.gmra.mrb[2].mxu0 %vm145_vm2, %v233_v33 }
 0x294   :  { %v316_v39 = vpop.f32.mrb[2].mxu0 }
 0x295   :  { %v317_v40 = vadd.f32 %v316_v39, %v243_v38  ;;  %v362_v41 = vpop.f32.mrb[3].mxu0 }
 0x297   :  { %v320_v42 = vmax.f32 %v317_v40, 0.0 }
 0x299   :  { %321 = vst [vmem:[%s485_s7] sm:$0x1] %v320_v42 }

</bundles_post_ra>
